<compile_context>
chip_gen: v5e
topology: v5e:2x2
jax: 0.10.0
libtpu: 0.0.40
codegen_flags: <defaults>
</compile_context>

<pallas_src>
import numpy as np
import jax
import jax.numpy as jnp
from jax.experimental import pallas as pl
from jax.experimental.pallas import tpu as pltpu


def _round_up(x, m):
    return (x + m - 1) // m * m


def so2_out_v_kernel(xs_ref, xr_ref, rth_ref, gd_ref, gx_ref, psw_ref,
                     w1s_ref, w1r_ref, b1_ref, w2_ref, b2_ref, out_ref):
    """One batch tile: SO(2) rotation + MLP + final output rotation."""
    xr = xr_ref[...]     # (tn, 2*J*L) interleaved features, flat index = j*2L + k*2 + m
    rth = rth_ref[...]   # (tn, 4*L)   rot_theta flattened,   flat index = k*4 + l*2 + m

    # SO(2) rotation, kept in the original interleaved feature layout:
    #   rot[n,(j,k,l)] = x[n,(j,k,l)]*R[n,k,l,l] + x[n,(j,k,1-l)]*R[n,k,l,1-l]
    # Coefficient rearrangement (lane gather + tile over J) and the within-pair swap
    # are expressed as constant 0/1 selection matmuls on the otherwise-idle MXU.
    cd = jnp.dot(rth, gd_ref[...], preferred_element_type=jnp.float32)   # R[n,k,l,l]
    cx = jnp.dot(rth, gx_ref[...], preferred_element_type=jnp.float32)   # R[n,k,l,1-l]
    xsw = jnp.dot(xr, psw_ref[...], preferred_element_type=jnp.float32)  # x[n,(j,k,1-l)]
    rot = xr * cd + xsw * cx

    # MLP layer 1: row-split W1 == fused [x_scalars | rot] @ W1 (exact, no concat).
    h = (jnp.dot(xs_ref[...], w1s_ref[...], preferred_element_type=jnp.float32)
         + jnp.dot(rot, w1r_ref[...], preferred_element_type=jnp.float32)
         + b1_ref[...])
    h = jnp.where(h > 0, h, 0.01 * h)        # leaky_relu(0.01)

    # MLP layer 2 -> (tn, 2)
    y = jnp.dot(h, w2_ref[...], preferred_element_type=jnp.float32) + b2_ref[...]

    # Final rotation: out[n,l] = y[n,0]*rot_theta[n,0,0,l] + y[n,1]*rot_theta[n,0,1,l]
    #   rth[:, 0:2] = rot_theta[n,0,0,:]   rth[:, 2:4] = rot_theta[n,0,1,:]
    out = y[:, 0:1] * rth[:, 0:2] + y[:, 1:2] * rth[:, 2:4]
    out_ref[...] = out.astype(out_ref.dtype)


def _selection_matrices(L, J):
    """Constant 0/1 matrices for in-kernel coefficient gather / pair swap."""
    L2 = 2 * L
    JL2 = J * L2
    gd = np.zeros((4 * L, JL2), np.float32)
    gx = np.zeros((4 * L, JL2), np.float32)
    for j in range(J):
        for k in range(L):
            for l in range(2):
                p = j * L2 + k * 2 + l
                gd[k * 4 + l * 2 + l, p] = 1.0          # picks R[n,k,l,l]
                gx[k * 4 + l * 2 + (1 - l), p] = 1.0    # picks R[n,k,l,1-l]
    psw = np.zeros((JL2, JL2), np.float32)
    for q in range(JL2):
        psw[q, q ^ 1] = 1.0                             # swap within (cos,sin) pairs
    return jnp.asarray(gd), jnp.asarray(gx), jnp.asarray(psw)


def so2_out_v(x_scalars, x_rot, rot_theta, params, *, L_max, num_rep, tn=1024):
    """Pallas forward of SO2OutV.

    x_scalars : (N, n_scalars)
    x_rot     : (N, num_rep, 2*L_max) or (N, num_rep*2*L_max), original interleaved order
    rot_theta : (N, L_max, 2, 2)
    params    : (W1, b1, W2, b2) of MLP(dim, [3*dim], 2)
    """
    f32 = jnp.float32
    N, S = x_scalars.shape
    J, L = num_rep, L_max
    JL2 = 2 * J * L
    L4 = 4 * L
    W1, b1, W2, b2 = params
    H = W1.shape[1]
    O = W2.shape[1]

    # Layout plumbing only: free reshapes, nothing materialized per-row.
    xs = x_scalars.astype(f32)
    xr = x_rot.reshape(N, JL2).astype(f32)
    rth = rot_theta.reshape(N, L4).astype(f32)

    # Large batch tile (multiple of 8); pad N to a multiple of it, slice at the end.
    tn_eff = min(_round_up(tn, 8), _round_up(N, 8))
    N_pad = _round_up(N, tn_eff)
    if N_pad != N:
        pad = ((0, N_pad - N), (0, 0))
        xs = jnp.pad(xs, pad)
        xr = jnp.pad(xr, pad)
        rth = jnp.pad(rth, pad)

    gd, gx, psw = _selection_matrices(L, J)

    W1s = W1[:S].astype(f32)     # scalar-feature rows
    W1r = W1[S:].astype(f32)     # rotated-feature rows, original interleaved order
    b1_2d = b1.reshape(1, H).astype(f32)
    b2_2d = b2.reshape(1, O).astype(f32)

    row_spec = lambda cols: pl.BlockSpec((tn_eff, cols), lambda i: (i, 0))
    full_spec = lambda shp: pl.BlockSpec(shp, lambda i: (0, 0))

    out = pl.pallas_call(
        so2_out_v_kernel,
        out_shape=jax.ShapeDtypeStruct((N_pad, O), f32),
        grid=(N_pad // tn_eff,),
        in_specs=[row_spec(S), row_spec(JL2), row_spec(L4),
                  full_spec((L4, JL2)), full_spec((L4, JL2)), full_spec((JL2, JL2)),
                  full_spec((S, H)), full_spec((JL2, H)), full_spec((1, H)),
                  full_spec((H, O)), full_spec((1, O))],
        out_specs=pl.BlockSpec((tn_eff, O), lambda i: (i, 0)),
        compiler_params=pltpu.CompilerParams(dimension_semantics=("parallel",)),
    )(xs, xr, rth, gd, gx, psw, W1s, W1r, b1_2d, W2.astype(f32), b2_2d)

    return out[:N]


def reference(x_scalars, x_rot, rot_theta, params, *, L_max, num_rep):
    """Pure-JAX mirror of the PyTorch SO2OutV.forward (for verification)."""
    W1, b1, W2, b2 = params
    N = x_scalars.shape[0]
    rot_inv = jnp.swapaxes(rot_theta, 2, 3)
    xr = x_rot.reshape(N, num_rep, L_max, 2)
    rotated = jnp.einsum('njkm,nkml->njkl', xr, rot_inv).reshape(N, -1)
    feat = jnp.concatenate([x_scalars, rotated], axis=1)
    h = feat @ W1 + b1
    h = jnp.where(h > 0, h, 0.01 * h)
    y = h @ W2 + b2
    # x.unsqueeze(1).bmm(rot_theta[:, 0, :]).squeeze(1)
    return jnp.einsum('nm,nml->nl', y, rot_theta[:, 0])


def _make_inputs(key, N, L_max, num_rep, n_scalars):
    dim = n_scalars + num_rep * L_max * 2
    hidden = dim * 3
    n_out = 2
    k1, k2, k3, k4, k5, k6, k7 = jax.random.split(key, 7)
    x_scalars = jax.random.normal(k1, (N, n_scalars), dtype=jnp.float32)
    x_rot = jax.random.normal(k2, (N, num_rep, L_max * 2), dtype=jnp.float32)
    theta = jax.random.uniform(k3, (N, L_max), dtype=jnp.float32) * 2 * jnp.pi
    c, s = jnp.cos(theta), jnp.sin(theta)
    rot_theta = jnp.stack(
        [jnp.stack([c, -s], axis=-1), jnp.stack([s, c], axis=-1)], axis=-2
    )  # (N, L_max, 2, 2)
    W1 = 0.1 * jax.random.normal(k4, (dim, hidden), dtype=jnp.float32)
    b1 = 0.1 * jax.random.normal(k5, (hidden,), dtype=jnp.float32)
    W2 = 0.1 * jax.random.normal(k6, (hidden, n_out), dtype=jnp.float32)
    b2 = 0.1 * jax.random.normal(k7, (n_out,), dtype=jnp.float32)
    return x_scalars, x_rot, rot_theta, (W1, b1, W2, b2), n_out


if __name__ == "__main__":
    L_max, num_rep, n_scalars = 4, 4, 8
    key = jax.random.PRNGKey(0)

    # Case 1: small aligned batch.
    xs, xr, rth, params, n_out = _make_inputs(key, 16, L_max, num_rep, n_scalars)
    out = so2_out_v(xs, xr, rth, params, L_max=L_max, num_rep=num_rep)
    out = jax.block_until_ready(out)
    ref = reference(xs, xr, rth, params, L_max=L_max, num_rep=num_rep)
    assert out.shape == (16, n_out)
    assert jnp.allclose(out, ref, rtol=1e-4, atol=1e-4), "mismatch vs reference (N=16)"

    # Case 2: batch not a multiple of 8 -> exercises the padding / masking path.
    xs2, xr2, rth2, params2, _ = _make_inputs(jax.random.PRNGKey(1), 37,
                                              L_max, num_rep, n_scalars)
    out2 = so2_out_v(xs2, xr2, rth2, params2, L_max=L_max, num_rep=num_rep)
    out2 = jax.block_until_ready(out2)
    ref2 = reference(xs2, xr2, rth2, params2, L_max=L_max, num_rep=num_rep)
    assert out2.shape == (37, n_out)
    assert jnp.allclose(out2, ref2, rtol=1e-4, atol=1e-4), "mismatch vs reference (N=37)"

    print("KERNEL_OK")
</pallas_src>

<mosaic_0001>
module attributes {stable_mosaic.version = 11 : i64} {
  func.func @so2_out_v_kernel(%arg0: i32, %arg1: memref<16x8xf32, #tpu.memory_space<vmem>>, %arg2: memref<16x32xf32, #tpu.memory_space<vmem>>, %arg3: memref<16x16xf32, #tpu.memory_space<vmem>>, %arg4: memref<16x32xf32, #tpu.memory_space<vmem>>, %arg5: memref<16x32xf32, #tpu.memory_space<vmem>>, %arg6: memref<32x32xf32, #tpu.memory_space<vmem>>, %arg7: memref<8x120xf32, #tpu.memory_space<vmem>>, %arg8: memref<32x120xf32, #tpu.memory_space<vmem>>, %arg9: memref<1x120xf32, #tpu.memory_space<vmem>>, %arg10: memref<120x2xf32, #tpu.memory_space<vmem>>, %arg11: memref<1x2xf32, #tpu.memory_space<vmem>>, %arg12: memref<16x2xf32, #tpu.memory_space<vmem>>) attributes {dimension_semantics = [#tpu.dimension_semantics<parallel>], iteration_bounds = array<i64: 1>, scalar_prefetch = 0 : i64, scratch_operands = 0 : i64, tpu.core_type = #tpu.core_type<tc>, window_params = [{transform_indices = @transform_0, window_bounds = array<i64: 16, 8>}, {transform_indices = @transform_1, window_bounds = array<i64: 16, 32>}, {transform_indices = @transform_2, window_bounds = array<i64: 16, 16>}, {pipeline_mode = #tpu.pipeline_mode<synchronous>, transform_indices = @transform_3, window_bounds = array<i64: 16, 32>}, {pipeline_mode = #tpu.pipeline_mode<synchronous>, transform_indices = @transform_4, window_bounds = array<i64: 16, 32>}, {pipeline_mode = #tpu.pipeline_mode<synchronous>, transform_indices = @transform_5, window_bounds = array<i64: 32, 32>}, {pipeline_mode = #tpu.pipeline_mode<synchronous>, transform_indices = @transform_6, window_bounds = array<i64: 8, 120>}, {pipeline_mode = #tpu.pipeline_mode<synchronous>, transform_indices = @transform_7, window_bounds = array<i64: 32, 120>}, {pipeline_mode = #tpu.pipeline_mode<synchronous>, transform_indices = @transform_8, window_bounds = array<i64: 1, 120>}, {pipeline_mode = #tpu.pipeline_mode<synchronous>, transform_indices = @transform_9, window_bounds = array<i64: 120, 2>}, {pipeline_mode = #tpu.pipeline_mode<synchronous>, transform_indices = @transform_10, window_bounds = array<i64: 1, 2>}, {transform_indices = @transform_11, window_bounds = array<i64: 16, 2>}]} {
    %c0 = arith.constant 0 : index
    %c0_0 = arith.constant 0 : index
    %0 = vector.load %arg2[%c0, %c0_0] : memref<16x32xf32, #tpu.memory_space<vmem>>, vector<16x32xf32>
    %c0_1 = arith.constant 0 : index
    %c0_2 = arith.constant 0 : index
    %1 = vector.load %arg3[%c0_1, %c0_2] : memref<16x16xf32, #tpu.memory_space<vmem>>, vector<16x16xf32>
    %c0_3 = arith.constant 0 : index
    %c0_4 = arith.constant 0 : index
    %2 = vector.load %arg4[%c0_3, %c0_4] : memref<16x32xf32, #tpu.memory_space<vmem>>, vector<16x32xf32>
    %cst = arith.constant dense<0.000000e+00> : vector<16x32xf32>
    %3 = tpu.matmul %1, %2, %cst {dimension_numbers = #tpu.dot_dimension_numbers<[1], [0], [0], [1], [0, 0, 1, 1], [], []>} : vector<16x16xf32>, vector<16x32xf32>, vector<16x32xf32> -> vector<16x32xf32>
    %c0_5 = arith.constant 0 : index
    %c0_6 = arith.constant 0 : index
    %4 = vector.load %arg5[%c0_5, %c0_6] : memref<16x32xf32, #tpu.memory_space<vmem>>, vector<16x32xf32>
    %cst_7 = arith.constant dense<0.000000e+00> : vector<16x32xf32>
    %5 = tpu.matmul %1, %4, %cst_7 {dimension_numbers = #tpu.dot_dimension_numbers<[1], [0], [0], [1], [0, 0, 1, 1], [], []>} : vector<16x16xf32>, vector<16x32xf32>, vector<16x32xf32> -> vector<16x32xf32>
    %c0_8 = arith.constant 0 : index
    %c0_9 = arith.constant 0 : index
    %6 = vector.load %arg6[%c0_8, %c0_9] : memref<32x32xf32, #tpu.memory_space<vmem>>, vector<32x32xf32>
    %cst_10 = arith.constant dense<0.000000e+00> : vector<16x32xf32>
    %7 = tpu.matmul %0, %6, %cst_10 {dimension_numbers = #tpu.dot_dimension_numbers<[1], [0], [0], [1], [0, 0, 1, 1], [], []>} : vector<16x32xf32>, vector<32x32xf32>, vector<16x32xf32> -> vector<16x32xf32>
    %8 = arith.mulf %0, %3 : vector<16x32xf32>
    %9 = arith.mulf %7, %5 : vector<16x32xf32>
    %10 = arith.addf %8, %9 : vector<16x32xf32>
    %c0_11 = arith.constant 0 : index
    %c0_12 = arith.constant 0 : index
    %11 = vector.load %arg1[%c0_11, %c0_12] : memref<16x8xf32, #tpu.memory_space<vmem>>, vector<16x8xf32>
    %c0_13 = arith.constant 0 : index
    %c0_14 = arith.constant 0 : index
    %12 = vector.load %arg7[%c0_13, %c0_14] : memref<8x120xf32, #tpu.memory_space<vmem>>, vector<8x120xf32>
    %cst_15 = arith.constant dense<0.000000e+00> : vector<16x120xf32>
    %13 = tpu.matmul %11, %12, %cst_15 {dimension_numbers = #tpu.dot_dimension_numbers<[1], [0], [0], [1], [0, 0, 1, 1], [], []>} : vector<16x8xf32>, vector<8x120xf32>, vector<16x120xf32> -> vector<16x120xf32>
    %c0_16 = arith.constant 0 : index
    %c0_17 = arith.constant 0 : index
    %14 = vector.load %arg8[%c0_16, %c0_17] : memref<32x120xf32, #tpu.memory_space<vmem>>, vector<32x120xf32>
    %cst_18 = arith.constant dense<0.000000e+00> : vector<16x120xf32>
    %15 = tpu.matmul %10, %14, %cst_18 {dimension_numbers = #tpu.dot_dimension_numbers<[1], [0], [0], [1], [0, 0, 1, 1], [], []>} : vector<16x32xf32>, vector<32x120xf32>, vector<16x120xf32> -> vector<16x120xf32>
    %16 = arith.addf %13, %15 : vector<16x120xf32>
    %c0_19 = arith.constant 0 : index
    %c0_20 = arith.constant 0 : index
    %17 = vector.load %arg9[%c0_19, %c0_20] : memref<1x120xf32, #tpu.memory_space<vmem>>, vector<1x120xf32>
    %18 = vector.broadcast %17 : vector<1x120xf32> to vector<16x120xf32>
    %19 = arith.addf %16, %18 : vector<16x120xf32>
    %cst_21 = arith.constant 0.000000e+00 : f32
    %20 = vector.broadcast %cst_21 : f32 to vector<16x120xf32>
    %21 = arith.cmpf ogt, %19, %20 : vector<16x120xf32>
    %cst_22 = arith.constant 0.00999999977 : f32
    %22 = vector.broadcast %cst_22 : f32 to vector<16x120xf32>
    %23 = arith.mulf %22, %19 : vector<16x120xf32>
    %24 = arith.select %21, %19, %23 : vector<16x120xi1>, vector<16x120xf32>
    %c0_23 = arith.constant 0 : index
    %c0_24 = arith.constant 0 : index
    %25 = vector.load %arg10[%c0_23, %c0_24] : memref<120x2xf32, #tpu.memory_space<vmem>>, vector<120x2xf32>
    %cst_25 = arith.constant dense<0.000000e+00> : vector<16x2xf32>
    %26 = tpu.matmul %24, %25, %cst_25 {dimension_numbers = #tpu.dot_dimension_numbers<[1], [0], [0], [1], [0, 0, 1, 1], [], []>} : vector<16x120xf32>, vector<120x2xf32>, vector<16x2xf32> -> vector<16x2xf32>
    %c0_26 = arith.constant 0 : index
    %c0_27 = arith.constant 0 : index
    %27 = vector.load %arg11[%c0_26, %c0_27] : memref<1x2xf32, #tpu.memory_space<vmem>>, vector<1x2xf32>
    %28 = vector.broadcast %27 : vector<1x2xf32> to vector<16x2xf32>
    %29 = arith.addf %26, %28 : vector<16x2xf32>
    %30 = vector.extract_strided_slice %29 {offsets = [0, 0], sizes = [16, 1], strides = [1, 1]} : vector<16x2xf32> to vector<16x1xf32>
    %31 = vector.extract_strided_slice %1 {offsets = [0, 0], sizes = [16, 2], strides = [1, 1]} : vector<16x16xf32> to vector<16x2xf32>
    %32 = vector.broadcast %30 : vector<16x1xf32> to vector<16x2xf32>
    %33 = arith.mulf %32, %31 : vector<16x2xf32>
    %34 = vector.extract_strided_slice %29 {offsets = [0, 1], sizes = [16, 1], strides = [1, 1]} : vector<16x2xf32> to vector<16x1xf32>
    %35 = vector.extract_strided_slice %1 {offsets = [0, 2], sizes = [16, 2], strides = [1, 1]} : vector<16x16xf32> to vector<16x2xf32>
    %36 = vector.broadcast %34 : vector<16x1xf32> to vector<16x2xf32>
    %37 = arith.mulf %36, %35 : vector<16x2xf32>
    %38 = arith.addf %33, %37 : vector<16x2xf32>
    %c0_28 = arith.constant 0 : index
    %c0_29 = arith.constant 0 : index
    %39 = vector.load %arg12[%c0_28, %c0_29] : memref<16x2xf32, #tpu.memory_space<vmem>>, vector<16x2xf32>
    tpu.vector_store %arg12[%c0_28, %c0_29], %38 {strides = array<i32>} : memref<16x2xf32, #tpu.memory_space<vmem>>, vector<16x2xf32>,
    return
  }
  func.func @transform_0(%arg0: i32) -> (i32, i32) {
    %c0_i32 = arith.constant 0 : i32
    %c0_i32_0 = arith.constant 0 : i32
    return %arg0, %c0_i32 : i32, i32
  }
  func.func @transform_1(%arg0: i32) -> (i32, i32) {
    %c0_i32 = arith.constant 0 : i32
    %c0_i32_0 = arith.constant 0 : i32
    return %arg0, %c0_i32 : i32, i32
  }
  func.func @transform_2(%arg0: i32) -> (i32, i32) {
    %c0_i32 = arith.constant 0 : i32
    %c0_i32_0 = arith.constant 0 : i32
    return %arg0, %c0_i32 : i32, i32
  }
  func.func @transform_3(%arg0: i32) -> (i32, i32) {
    %c0_i32 = arith.constant 0 : i32
    %c0_i32_0 = arith.constant 0 : i32
    %c0_i32_1 = arith.constant 0 : i32
    return %c0_i32, %c0_i32_0 : i32, i32
  }
  func.func @transform_4(%arg0: i32) -> (i32, i32) {
    %c0_i32 = arith.constant 0 : i32
    %c0_i32_0 = arith.constant 0 : i32
    %c0_i32_1 = arith.constant 0 : i32
    return %c0_i32, %c0_i32_0 : i32, i32
  }
  func.func @transform_5(%arg0: i32) -> (i32, i32) {
    %c0_i32 = arith.constant 0 : i32
    %c0_i32_0 = arith.constant 0 : i32
    %c0_i32_1 = arith.constant 0 : i32
    return %c0_i32, %c0_i32_0 : i32, i32
  }
  func.func @transform_6(%arg0: i32) -> (i32, i32) {
    %c0_i32 = arith.constant 0 : i32
    %c0_i32_0 = arith.constant 0 : i32
    %c0_i32_1 = arith.constant 0 : i32
    return %c0_i32, %c0_i32_0 : i32, i32
  }
  func.func @transform_7(%arg0: i32) -> (i32, i32) {
    %c0_i32 = arith.constant 0 : i32
    %c0_i32_0 = arith.constant 0 : i32
    %c0_i32_1 = arith.constant 0 : i32
    return %c0_i32, %c0_i32_0 : i32, i32
  }
  func.func @transform_8(%arg0: i32) -> (i32, i32) {
    %c0_i32 = arith.constant 0 : i32
    %c0_i32_0 = arith.constant 0 : i32
    %c0_i32_1 = arith.constant 0 : i32
    return %c0_i32, %c0_i32_0 : i32, i32
  }
  func.func @transform_9(%arg0: i32) -> (i32, i32) {
    %c0_i32 = arith.constant 0 : i32
    %c0_i32_0 = arith.constant 0 : i32
    %c0_i32_1 = arith.constant 0 : i32
    return %c0_i32, %c0_i32_0 : i32, i32
  }
  func.func @transform_10(%arg0: i32) -> (i32, i32) {
    %c0_i32 = arith.constant 0 : i32
    %c0_i32_0 = arith.constant 0 : i32
    %c0_i32_1 = arith.constant 0 : i32
    return %c0_i32, %c0_i32_0 : i32, i32
  }
  func.func @transform_11(%arg0: i32) -> (i32, i32) {
    %c0_i32 = arith.constant 0 : i32
    %c0_i32_0 = arith.constant 0 : i32
    return %arg0, %c0_i32 : i32, i32
  }
}

</mosaic_0001>

<bundles_post_ra>
// kernel: tpu_custom_call.1
= control target key start
LH: loop header
LB: loop body
LE: loop exit
PB: predicated region body
PF: predicated region fallthrough
CT: control target
= control target key end

     0   :  { %vm44_vm0 = vcmask 130048   ;;  %vm103_vm1 = vcmask 261120   ;;  %vm175_vm2 = vcmask 64512   ;;  %vm236_vm4 = vcmask 982016   ;;  %s521_s4 = inlined_call_operand.vmem [shape: f32[16,32], index: 4, kind: input, shape index: {}]   ;;  %s522_s2 = inlined_call_operand.vmem [shape: f32[16,16], index: 2, kind: input, shape index: {}]   ;;  %s523_s5 = inlined_call_operand.vmem [shape: f32[32,32], index: 5, kind: input, shape index: {}]   ;;  %s524_s3 = inlined_call_operand.vmem [shape: f32[16,32], index: 3, kind: input, shape index: {}]   ;;  %s525_s1 = inlined_call_operand.vmem [shape: f32[16,32], index: 1, kind: input, shape index: {}]   ;;  %s526_s6 = inlined_call_operand.vmem [shape: f32[8,120], index: 6, kind: input, shape index: {}]   ;;  %s527_s7 = inlined_call_operand.vmem [shape: f32[32,120], index: 7, kind: input, shape index: {}]   ;;  %s528_s0 = inlined_call_operand.vmem [shape: f32[16,8], index: 0, kind: input, shape index: {}]   ;;  %s529_s9 = inlined_call_operand.vmem [shape: f32[120,2], index: 9, kind: input, shape index: {}]   ;;  %s530_s8 = inlined_call_operand.vmem [shape: f32[1,120], index: 8, kind: input, shape index: {}]   ;;  %s531_s10 = inlined_call_operand.vmem [shape: f32[1,2], index: 10, kind: input, shape index: {}]   ;;  %s532_s11 = inlined_call_operand.vmem [shape: f32[16,2], index: 11, kind: output, shape index: {}]  }
   0x1   :  { %v75_v0 = vld [vmem:[%s521_s4 + $0x8] sm:$0xff]  ;;  %v74_v1 = vld [vmem:[%s521_s4] sm:$0xff]  ;;  %v102_v3 = vld [vmem:[%s523_s5 + $0x18] sm:$0xff]  ;;  %v324_v59 = vmov 1   ;;  %v325_v60 = vmov 0   ;;  %vm298_vm6 = vcmask 15360  }
   0x2   :  { %90 = vmatpush.msra.mxu2 %v75_v0  ;;  %v396_v2 = vld [vmem:[%s522_s2] sm:$0xff]  ;;  %v43_v4 = vld [vmem:[%s524_s3 + $0x8] sm:$0xff]  ;;  %v101_v6 = vld [vmem:[%s523_s5 + $0x10] sm:$0xff]  ;;  %320 = vset.pattern.permute.xlu0 %v324_v59 }
   0x3   :  { %v42_v5 = vld [vmem:[%s524_s3] sm:$0xff]  ;;  %65 = vmatpush.msra.mxu0 %v43_v4  ;;  %v100_v7 = vld [vmem:[%s523_s5 + $0x8] sm:$0xff]  ;;  %v145_v13 = vld [vmem:[%s527_s7 + $0x18] sm:$0xff]  ;;  %321 = vset.pattern.permute.xlu1 %v325_v60  ;;  %s326_s3 = smov 126  }
   0x4   :  { %91 = vmatpush.msra.mxu2 %v74_v1  ;;  %v99_v8 = vld [vmem:[%s523_s5] sm:$0xff]  ;;  %v423_v9 = vld [vmem:[%s522_s2 + $0x8] sm:$0xff]  ;;  %164 = vmatpush.msra.mxu3 %v145_v13  ;;  %v144_v14 = vld [vmem:[%s527_s7 + $0x10] sm:$0xff] }
   0x5   :  { %307 = vmatmul.msk.f32.vlgmr.msra.gmra.mxu2 %vm44_vm0, %v396_v2  ;;  %66 = vmatpush.msra.mxu0 %v42_v5  ;;  %v38_v10 = vld [vmem:[%s525_s1] sm:$0xff]  ;;  %v39_v11 = vld [vmem:[%s525_s1 + $0x8] sm:$0xff]  ;;  %v231_v18 = vld [vmem:[%s529_s9 + $0x70] sm:$0xff] }
   0x6   :  { %122 = vmatpush.msrb.mxu2 %v102_v3  ;;  %305 = vmatmul.msk.f32.vlgmr.msra.gmra.mxu0 %vm44_vm0, %v396_v2  ;;  %v141_v12 = vld [vmem:[%s526_s6] sm:$0xff]  ;;  %v143_v15 = vld [vmem:[%s527_s7 + $0x8] sm:$0xff]  ;;  %v228_v23 = vld [vmem:[%s529_s9 + $0x58] sm:$0xff] }
   0x7   :  { %197 = vmatpush.msrb.mxu0 %v141_v12  ;;  %165 = vmatpush.msra.mxu3 %v144_v14  ;;  %v142_v16 = vld [vmem:[%s527_s7] sm:$0xff]  ;;  %v230_v19 = vld [vmem:[%s529_s9 + $0x68] sm:$0xff]  ;;  %v227_v24 = vld [vmem:[%s529_s9 + $0x50] sm:$0xff] }
   0x8   :  { %123 = vmatpush.msrb.mxu2 %v101_v6  ;;  %v139_v17 = vld [vmem:[%s528_s0] sm:$0xff]  ;;  %244 = vmatpush.msra.mxu1 %v231_v18  ;;  %v140_v22 = vld [vmem:[%s528_s0 + $0x8] sm:$0xff]  ;;  %v224_v28 = vld [vmem:[%s529_s9 + $0x38] sm:$0xff] }
   0x9   :  { %166 = vmatpush.msra.mxu3 %v143_v15  ;;  %v229_v20 = vld [vmem:[%s529_s9 + $0x60] sm:$0xff]  ;;  %v226_v25 = vld [vmem:[%s529_s9 + $0x48] sm:$0xff]  ;;  %v223_v30 = vld [vmem:[%s529_s9 + $0x30] sm:$0xff] }
   0xa   :  { %124 = vmatpush.msrb.mxu2 %v100_v7  ;;  %245 = vmatpush.msra.mxu1 %v230_v19  ;;  %v225_v26 = vld [vmem:[%s529_s9 + $0x40] sm:$0xff]  ;;  %v222_v31 = vld [vmem:[%s529_s9 + $0x28] sm:$0xff]  ;;  %v220_v42 = vld [vmem:[%s529_s9 + $0x18] sm:$0xff] }
   0xb   :  { %167 = vmatpush.msra.mxu3 %v142_v16  ;;  %v221_v33 = vld [vmem:[%s529_s9 + $0x20] sm:$0xff]  ;;  %v219_v43 = vld [vmem:[%s529_s9 + $0x10] sm:$0xff]  ;;  %v218_v44 = vld [vmem:[%s529_s9 + $0x8] sm:$0xff] }
   0xc   :  { %125 = vmatpush.msrb.mxu2 %v99_v8  ;;  %246 = vmatpush.msra.mxu1 %v229_v20  ;;  %v217_v45 = vld [vmem:[%s529_s9] sm:$0xff] }
   0xd   :  { %308 = vmatmul.msk.f32.gmra.mxu2 %vm44_vm0, %v423_v9  ;;  %v322_v47 = vld [vmem:[%s530_s8] ss:$0 sm:$0xff] }
   0xe   :  { %306 = vmatmul.msk.f32.gmra.mxu0 %vm44_vm0, %v423_v9  ;;  %247 = vmatpush.msra.mxu1 %v228_v23  ;;  %v323_v61 = vld [vmem:[%s531_s10] ss:$0 sm:$0xff] }
  0x10   :  { %248 = vmatpush.msra.mxu1 %v227_v24 }
  0x12   :  { %249 = vmatpush.msra.mxu1 %v226_v25 }
  0x14   :  { %250 = vmatpush.msra.mxu1 %v225_v26 }
  0x15   :  { %309 = vmatmul.msk.f32.vlgmr.msrb.gmra.mxu2 %vm103_vm1, %v38_v10 }
  0x16   :  { %313 = vmatmul.msk.f32.vlgmr.msrb.gmra.mxu0 %vm175_vm2, %v139_v17  ;;  %251 = vmatpush.msra.mxu1 %v224_v28 }
  0x18   :  { %252 = vmatpush.msra.mxu1 %v223_v30 }
  0x1a   :  { %253 = vmatpush.msra.mxu1 %v222_v31 }
  0x1c   :  { %254 = vmatpush.msra.mxu1 %v221_v33 }
  0x1d   :  { %310 = vmatmul.msk.f32.gmra.mxu2 %vm103_vm1, %v39_v11 }
  0x1e   :  { %314 = vmatmul.msk.f32.gmra.mxu0 %vm175_vm2, %v140_v22  ;;  %255 = vmatpush.msra.mxu1 %v220_v42 }
  0x20   :  { %256 = vmatpush.msra.mxu1 %v219_v43 }
  0x22   :  { %257 = vmatpush.msra.mxu1 %v218_v44 }
  0x24   :  { %258 = vmatpush.msra.mxu1 %v217_v45 }
  0x83   :  { %v68_v29 = vpop.f32.mrf.mxu0 }
  0x84   :  { %v133_v32 = vmul.f32 %v68_v29, %v38_v10 }
  0x88   :  { %v93_v21 = vpop.f32.mrf.mxu2 }
  0x8b   :  { %v71_v37 = vpop.f32.mrf.mxu0 }
  0x8c   :  { %v134_v38 = vmul.f32 %v71_v37, %v39_v11 }
  0x90   :  { %v96_v27 = vpop.f32.mrf.mxu2 }
  0x93   :  { %v199_v46 = vpop.f32.mrf.mxu0 }
  0x98   :  { %v127_v34 = vpop.f32.mrf.mxu2 }
  0x99   :  { %v135_v35 = vmul.f32 %v127_v34, %v93_v21 }
  0x9b   :  { %v137_v36 = vadd.f32 %v135_v35, %v133_v32  ;;  %v202_v52 = vpop.f32.mrf.mxu0 }
  0x9d   :  { %311 = vmatmul.msk.f32.vlgmr.msra.gmra.mxu3 %vm103_vm1, %v137_v36 }
  0xa0   :  { %v130_v39 = vpop.f32.mrf.mxu2 }
  0xa1   :  { %v136_v40 = vmul.f32 %v130_v39, %v96_v27 }
  0xa3   :  { %v138_v41 = vadd.f32 %v136_v40, %v134_v38 }
  0xa5   :  { %312 = vmatmul.msk.f32.gmra.mxu3 %vm103_vm1, %v138_v41 }
 0x120   :  { %v169_v48 = vpop.f32.mrf.mxu3 }
 0x121   :  { %v200_v49 = vadd.f32 %v199_v46, %v169_v48 }
 0x123   :  { %v209_v50 = vadd.f32 %v322_v47, %v200_v49 }
 0x125   :  { %vm211_vm3 = vcmp.gt.f32.partialorder %v209_v50, 0.0  ;;  %v213_v51 = vmul.f32 0.01, %v209_v50 }
 0x127   :  { %v215_v53 = vsel %vm211_vm3, %v209_v50, %v213_v51 }
 0x128   :  { %v172_v54 = vpop.f32.mrf.mxu3  ;;  %315 = vmatmul.msk.f32.vlgmr.msra.gmra.mxu1 %vm236_vm4, %v215_v53 }
 0x129   :  { %v203_v55 = vadd.f32 %v202_v52, %v172_v54 }
 0x12b   :  { %v210_v56 = vadd.f32 %v322_v47, %v203_v55 }
 0x12d   :  { %vm212_vm5 = vcmp.gt.f32.partialorder %v210_v56, 0.0  ;;  %v214_v57 = vmul.f32 0.01, %v210_v56 }
 0x12f   :  { %v216_v58 = vsel %vm212_vm5, %v210_v56, %v214_v57 }
 0x130   :  { %316 = vmatmul.msk.f32.gmra.mxu1 %vm236_vm4, %v216_v58 }
 0x1a5   :  { %v260_v62 = vpop.f32.mrf.mxu1 }
 0x1a6   :  { %v261_v63 = vadd.f32 %v323_v61, %v260_v62 }
 0x1a8   :  { %268 = vperm.xlu1 %321, %v261_v63   ;;  %279 = vperm.xlu0 %320, %v261_v63  }
 0x1ad   :  { %v263_v0 = vpop.f32.mrf.mxu1 }
 0x1ae   :  { %v264_v1 = vadd.f32 %v323_v61, %v263_v0 }
 0x1b0   :  { %273 = vperm.xlu1 %321, %v264_v1   ;;  %283 = vperm.xlu0 %320, %v264_v1  }
 0x21a   :  { %v280_v3 = vpop.permute.xlu0 %279  ;;  %v269_v7 = vpop.permute.xlu1 %268 }
 0x21b   :  { %v286_v4 = vmul.f32 %v280_v3, %v396_v2  ;;  %v276_v8 = vmul.f32 %v269_v7, %v396_v2 }
 0x21d   :  { %290 = vrot.lane.b32.xlu2 %v286_v4, %s326_s3 }
 0x222   :  { %v284_v5 = vpop.permute.xlu0 %283  ;;  %v274_v12 = vpop.permute.xlu1 %273 }
 0x223   :  { %v287_v6 = vmul.f32 %v284_v5, %v423_v9  ;;  %v277_v13 = vmul.f32 %v274_v12, %v423_v9 }
 0x225   :  { %292 = vrot.lane.b32.xlu2 %v287_v6, %s326_s3 }
 0x277   :  { %v291_v10 = vpop.permute.xlu2 %290 }
 0x278   :  { %v296_v11 = vadd.f32 %v291_v10, %v276_v8 }
 0x27a   :  { %299 = vst.msk [vmem:[%s532_s11] sm:$0xff] %vm298_vm6, %v296_v11 }
 0x27f   :  { %v293_v14 = vpop.permute.xlu2 %292 }
 0x280   :  { %v297_v15 = vadd.f32 %v293_v14, %v277_v13 }
 0x282   :  { %300 = vst.msk [vmem:[%s532_s11 + $0x8] sm:$0xff] %vm298_vm6, %v297_v15 }

</bundles_post_ra>
